<compile_context>
chip_gen: v5e
topology: v5e:2x2
jax: 0.10.0
libtpu: 0.0.40
codegen_flags: <defaults>
</compile_context>

<pallas_src>
import functools
import math

import jax
import jax.numpy as jnp
from jax import lax
from jax.experimental import pallas as pl
from jax.experimental.pallas import tpu as pltpu

EPS = 1e-5


def _round_up(a, b):
    return (a + b - 1) // b * b


# ---------------------------------------------------------------------------
# Pass A: conv-as-matmul (+ bias), accumulate per-channel sum / sum-of-squares,
# finalize folded BN affine (scale, shift) at the last grid step.
# ---------------------------------------------------------------------------
def _conv_stats_kernel(p_ref, w_ref, b_ref, g_ref, beta_ref,
                       x_ref, scale_ref, shift_ref,
                       sum_acc, sq_acc,
                       *, rows_total, needs_mask):
    i = pl.program_id(0)

    @pl.when(i == 0)
    def _init():
        sum_acc[...] = jnp.zeros_like(sum_acc)
        sq_acc[...] = jnp.zeros_like(sq_acc)

    # MXU matmul with f32 accumulation, then bias add.
    x = jnp.dot(p_ref[...], w_ref[...], preferred_element_type=jnp.float32)
    x = x + b_ref[...]
    x_ref[...] = x

    if needs_mask:
        tr = x.shape[0]
        row = i * tr + lax.broadcasted_iota(jnp.int32, (tr, 1), 0)
        xm = jnp.where(row < rows_total, x, 0.0)
    else:
        xm = x
    sum_acc[...] += jnp.sum(xm, axis=0, keepdims=True)
    sq_acc[...] += jnp.sum(xm * x, axis=0, keepdims=True)

    @pl.when(i == pl.num_programs(0) - 1)
    def _finalize():
        inv_n = 1.0 / rows_total
        mean = sum_acc[...] * inv_n
        var = sq_acc[...] * inv_n - mean * mean        # biased variance (training BN)
        sc = g_ref[...] * lax.rsqrt(var + EPS)
        scale_ref[...] = sc
        shift_ref[...] = beta_ref[...] - mean * sc


# ---------------------------------------------------------------------------
# Pass B: streaming normalize with the folded per-channel affine.
# ---------------------------------------------------------------------------
def _normalize_kernel(x_ref, scale_ref, shift_ref, y_ref):
    y_ref[...] = x_ref[...] * scale_ref[...] + shift_ref[...]


def _im2col_nchw(x, kernel_size, stride):
    """x: (N, Cin, H, W) -> patches (N*Ho*Wo, Cin*K*K) with feature order (cin, ki, kj)."""
    N, Cin, H, W = x.shape
    K = kernel_size
    Ho = (H - K) // stride + 1
    Wo = (W - K) // stride + 1
    taps = []
    for ki in range(K):
        for kj in range(K):
            taps.append(x[:, :, ki:ki + stride * Ho:stride, kj:kj + stride * Wo:stride])
    p = jnp.stack(taps, axis=2)                         # (N, Cin, K*K, Ho, Wo)
    p = p.reshape(N, Cin * K * K, Ho, Wo)
    p = jnp.transpose(p, (0, 2, 3, 1)).reshape(N * Ho * Wo, Cin * K * K)
    return p, Ho, Wo


def fea_split_forward(x_nchw, conv_w, conv_b, bn_w, bn_b, *,
                      kernel_size, stride, row_tile=512):
    """Forward of `fea_split`. Returns (x, x1, x2) in NCHW, matching PyTorch."""
    N, Cin, H, W = x_nchw.shape
    Cout = conv_w.shape[0]
    Ch = Cout // 2
    K = kernel_size
    Ck = Cin * K * K

    # bf16 patches/weights halve HBM traffic & VMEM footprint and double MXU throughput;
    # accumulation stays f32 (preferred_element_type).
    patches, Ho, Wo = _im2col_nchw(x_nchw.astype(jnp.bfloat16), K, stride)
    R = N * Ho * Wo

    # Row tile: multiple of 16 (bf16 sublane packing), capped by row_tile.
    TR = min(_round_up(row_tile, 16), _round_up(R, 16))
    R_pad = _round_up(R, TR)
    Ck_pad = max(128, _round_up(Ck, 128))               # MXU-aligned contraction dim
    needs_mask = R_pad != R

    patches = jnp.pad(patches, ((0, R_pad - R), (0, Ck_pad - Ck)))
    w_flat = jnp.pad(conv_w.reshape(Cout, Ck).T.astype(jnp.bfloat16),
                     ((0, Ck_pad - Ck), (0, 0)))        # (Ck_pad, Cout)
    b2d = conv_b.reshape(1, Cout).astype(jnp.float32)
    # gamma/beta are shared by the two halves -> tile to full Cout width, normalize the
    # lane-dense (R, Cout) tensor once, split channels in the wrapper.
    g2d = jnp.tile(bn_w.astype(jnp.float32), 2).reshape(1, Cout)
    beta2d = jnp.tile(bn_b.astype(jnp.float32), 2).reshape(1, Cout)

    grid = (R_pad // TR,)

    # ---- Pass A: conv + stats -> x, (scale, shift) -------------------------------
    kernel_a = functools.partial(_conv_stats_kernel,
                                 rows_total=R, needs_mask=needs_mask)
    vmem_a = 4 * (2 * TR * Ck_pad * 2 + 2 * TR * Cout * 4 + 2 * Ck_pad * Cout * 2)
    vmem_a = min(max(vmem_a, 4 * 1024 * 1024), 32 * 1024 * 1024)
    cost_a = pl.CostEstimate(
        flops=2 * R_pad * Ck_pad * Cout,
        transcendentals=Cout,
        bytes_accessed=R_pad * Ck_pad * 2 + Ck_pad * Cout * 2 + R_pad * Cout * 4)

    x_pad, scale, shift = pl.pallas_call(
        kernel_a,
        out_shape=(
            jax.ShapeDtypeStruct((R_pad, Cout), jnp.float32),
            jax.ShapeDtypeStruct((1, Cout), jnp.float32),
            jax.ShapeDtypeStruct((1, Cout), jnp.float32),
        ),
        grid=grid,
        in_specs=[
            pl.BlockSpec((TR, Ck_pad), lambda i: (i, 0)),
            pl.BlockSpec((Ck_pad, Cout), lambda i: (0, 0)),
            pl.BlockSpec((1, Cout), lambda i: (0, 0)),
            pl.BlockSpec((1, Cout), lambda i: (0, 0)),
            pl.BlockSpec((1, Cout), lambda i: (0, 0)),
        ],
        out_specs=(
            pl.BlockSpec((TR, Cout), lambda i: (i, 0)),
            pl.BlockSpec((1, Cout), lambda i: (0, 0)),
            pl.BlockSpec((1, Cout), lambda i: (0, 0)),
        ),
        scratch_shapes=[pltpu.VMEM((1, Cout), jnp.float32),
                        pltpu.VMEM((1, Cout), jnp.float32)],
        compiler_params=pltpu.CompilerParams(
            dimension_semantics=("arbitrary",),
            vmem_limit_bytes=vmem_a),
        cost_estimate=cost_a,
    )(patches, w_flat, b2d, g2d, beta2d)

    # ---- Pass B: y = x * scale + shift (streaming, parallel across row tiles) ----
    vmem_b = min(max(4 * 2 * TR * Cout * 4, 4 * 1024 * 1024), 32 * 1024 * 1024)
    cost_b = pl.CostEstimate(
        flops=2 * R_pad * Cout,
        transcendentals=0,
        bytes_accessed=2 * R_pad * Cout * 4)

    y_pad = pl.pallas_call(
        _normalize_kernel,
        out_shape=jax.ShapeDtypeStruct((R_pad, Cout), jnp.float32),
        grid=grid,
        in_specs=[
            pl.BlockSpec((TR, Cout), lambda i: (i, 0)),
            pl.BlockSpec((1, Cout), lambda i: (0, 0)),
            pl.BlockSpec((1, Cout), lambda i: (0, 0)),
        ],
        out_specs=pl.BlockSpec((TR, Cout), lambda i: (i, 0)),
        compiler_params=pltpu.CompilerParams(
            dimension_semantics=("parallel",),
            vmem_limit_bytes=vmem_b),
        cost_estimate=cost_b,
    )(x_pad, scale, shift)

    def to_nchw(v, c):
        return jnp.transpose(v.reshape(N, Ho, Wo, c), (0, 3, 1, 2))

    x_out = to_nchw(x_pad[:R], Cout)
    y_out = to_nchw(y_pad[:R], Cout)
    return x_out, y_out[:, :Ch], y_out[:, Ch:]


def _reference(x_nchw, conv_w, conv_b, bn_w, bn_b, *, stride):
    """Pure-JAX reference (same bf16 input quantization as the kernel path)."""
    xq = x_nchw.astype(jnp.bfloat16).astype(jnp.float32)
    wq = conv_w.astype(jnp.bfloat16).astype(jnp.float32)
    x = lax.conv_general_dilated(
        xq, wq, window_strides=(stride, stride), padding="VALID",
        dimension_numbers=("NCHW", "OIHW", "NCHW"),
    ) + conv_b.reshape(1, -1, 1, 1).astype(jnp.float32)
    Cout = x.shape[1]
    x1, x2 = x[:, :Cout // 2], x[:, Cout // 2:]

    def bn(v):
        mean = jnp.mean(v, axis=(0, 2, 3), keepdims=True)
        var = jnp.mean((v - mean) ** 2, axis=(0, 2, 3), keepdims=True)
        return (v - mean) * lax.rsqrt(var + EPS) * bn_w.reshape(1, -1, 1, 1) \
               + bn_b.reshape(1, -1, 1, 1)

    return x, bn(x1), bn(x2)


if __name__ == "__main__":
    def run_case(key, *, N, Cin, H, W, embed_dim, kernel_size, stride, row_tile,
                 random_affine):
        k_x, k_w, k_b, k_g, k_be = jax.random.split(key, 5)
        x = jax.random.normal(k_x, (N, Cin, H, W), dtype=jnp.float32)

        # Conv2d init per _init_weights: normal(0, sqrt(2 / fan_out)); bias = 0.
        fan_out = kernel_size * kernel_size * embed_dim
        conv_w = jax.random.normal(
            k_w, (embed_dim, Cin, kernel_size, kernel_size),
            dtype=jnp.float32) * math.sqrt(2.0 / fan_out)
        if random_affine:
            conv_b = 0.1 * jax.random.normal(k_b, (embed_dim,), dtype=jnp.float32)
            bn_w = 1.0 + 0.1 * jax.random.normal(k_g, (embed_dim // 2,), jnp.float32)
            bn_b = 0.1 * jax.random.normal(k_be, (embed_dim // 2,), jnp.float32)
        else:
            conv_b = jnp.zeros((embed_dim,), jnp.float32)
            bn_w = jnp.ones((embed_dim // 2,), jnp.float32)   # BatchNorm2d default init
            bn_b = jnp.zeros((embed_dim // 2,), jnp.float32)

        fwd = jax.jit(functools.partial(
            fea_split_forward, kernel_size=kernel_size, stride=stride,
            row_tile=row_tile))
        out = jax.block_until_ready(fwd(x, conv_w, conv_b, bn_w, bn_b))
        ref = _reference(x, conv_w, conv_b, bn_w, bn_b, stride=stride)
        for got, want in zip(out, ref):
            assert got.shape == want.shape, (got.shape, want.shape)
            err = float(jnp.max(jnp.abs(got - want)))
            assert jnp.allclose(got, want, rtol=2e-3, atol=2e-3), err

    key = jax.random.PRNGKey(0)
    k1, k2 = jax.random.split(key)
    # Multi-tile grid, exact tiling (R = 32 rows, row tile 16, default BN init).
    run_case(k1, N=2, Cin=3, H=19, W=19, embed_dim=16,
             kernel_size=7, stride=4, row_tile=16, random_affine=False)
    # Ragged last tile (R = 75 rows, row tile 16 -> masked stats), nontrivial affine.
    run_case(k2, N=3, Cin=3, H=23, W=23, embed_dim=32,
             kernel_size=7, stride=4, row_tile=16, random_affine=True)

    print("KERNEL_OK")
</pallas_src>

<mosaic_0001>
module attributes {stable_mosaic.version = 11 : i64} {
  func.func @_normalize_kernel(%arg0: i32, %arg1: memref<16x16xf32, #tpu.memory_space<vmem>>, %arg2: memref<1x16xf32, #tpu.memory_space<vmem>>, %arg3: memref<1x16xf32, #tpu.memory_space<vmem>>, %arg4: memref<16x16xf32, #tpu.memory_space<vmem>>) attributes {dimension_semantics = [#tpu.dimension_semantics<parallel>], iteration_bounds = array<i64: 2>, scalar_prefetch = 0 : i64, scratch_operands = 0 : i64, tpu.core_type = #tpu.core_type<tc>, window_params = [{transform_indices = @transform_0, window_bounds = array<i64: 16, 16>}, {pipeline_mode = #tpu.pipeline_mode<synchronous>, transform_indices = @transform_1, window_bounds = array<i64: 1, 16>}, {pipeline_mode = #tpu.pipeline_mode<synchronous>, transform_indices = @transform_2, window_bounds = array<i64: 1, 16>}, {transform_indices = @transform_3, window_bounds = array<i64: 16, 16>}]} {
    %c0 = arith.constant 0 : index
    %c0_0 = arith.constant 0 : index
    %0 = vector.load %arg1[%c0, %c0_0] : memref<16x16xf32, #tpu.memory_space<vmem>>, vector<16x16xf32>
    %c0_1 = arith.constant 0 : index
    %c0_2 = arith.constant 0 : index
    %1 = vector.load %arg2[%c0_1, %c0_2] : memref<1x16xf32, #tpu.memory_space<vmem>>, vector<1x16xf32>
    %2 = vector.broadcast %1 : vector<1x16xf32> to vector<16x16xf32>
    %3 = arith.mulf %0, %2 : vector<16x16xf32>
    %c0_3 = arith.constant 0 : index
    %c0_4 = arith.constant 0 : index
    %4 = vector.load %arg3[%c0_3, %c0_4] : memref<1x16xf32, #tpu.memory_space<vmem>>, vector<1x16xf32>
    %5 = vector.broadcast %4 : vector<1x16xf32> to vector<16x16xf32>
    %6 = arith.addf %3, %5 : vector<16x16xf32>
    %c0_5 = arith.constant 0 : index
    %c0_6 = arith.constant 0 : index
    %7 = vector.load %arg4[%c0_5, %c0_6] : memref<16x16xf32, #tpu.memory_space<vmem>>, vector<16x16xf32>
    tpu.vector_store %arg4[%c0_5, %c0_6], %6 {strides = array<i32>} : memref<16x16xf32, #tpu.memory_space<vmem>>, vector<16x16xf32>,
    return
  }
  func.func @transform_0(%arg0: i32) -> (i32, i32) {
    %c0_i32 = arith.constant 0 : i32
    %c0_i32_0 = arith.constant 0 : i32
    return %arg0, %c0_i32 : i32, i32
  }
  func.func @transform_1(%arg0: i32) -> (i32, i32) {
    %c0_i32 = arith.constant 0 : i32
    %c0_i32_0 = arith.constant 0 : i32
    %c0_i32_1 = arith.constant 0 : i32
    return %c0_i32, %c0_i32_0 : i32, i32
  }
  func.func @transform_2(%arg0: i32) -> (i32, i32) {
    %c0_i32 = arith.constant 0 : i32
    %c0_i32_0 = arith.constant 0 : i32
    %c0_i32_1 = arith.constant 0 : i32
    return %c0_i32, %c0_i32_0 : i32, i32
  }
  func.func @transform_3(%arg0: i32) -> (i32, i32) {
    %c0_i32 = arith.constant 0 : i32
    %c0_i32_0 = arith.constant 0 : i32
    return %arg0, %c0_i32 : i32, i32
  }
}

module attributes {stable_mosaic.version = 11 : i64} {
  func.func @_conv_stats_kernel(%arg0: i32, %arg1: memref<16x256xbf16, #tpu.memory_space<vmem>>, %arg2: memref<256x16xbf16, #tpu.memory_space<vmem>>, %arg3: memref<1x16xf32, #tpu.memory_space<vmem>>, %arg4: memref<1x16xf32, #tpu.memory_space<vmem>>, %arg5: memref<1x16xf32, #tpu.memory_space<vmem>>, %arg6: memref<16x16xf32, #tpu.memory_space<vmem>>, %arg7: memref<1x16xf32, #tpu.memory_space<vmem>>, %arg8: memref<1x16xf32, #tpu.memory_space<vmem>>, %arg9: memref<1x16xf32, #tpu.memory_space<vmem>>, %arg10: memref<1x16xf32, #tpu.memory_space<vmem>>) attributes {dimension_semantics = [#tpu.dimension_semantics<arbitrary>], iteration_bounds = array<i64: 2>, scalar_prefetch = 0 : i64, scratch_operands = 2 : i64, tpu.core_type = #tpu.core_type<tc>, window_params = [{transform_indices = @transform_0, window_bounds = array<i64: 16, 256>}, {pipeline_mode = #tpu.pipeline_mode<synchronous>, transform_indices = @transform_1, window_bounds = array<i64: 256, 16>}, {pipeline_mode = #tpu.pipeline_mode<synchronous>, transform_indices = @transform_2, window_bounds = array<i64: 1, 16>}, {pipeline_mode = #tpu.pipeline_mode<synchronous>, transform_indices = @transform_3, window_bounds = array<i64: 1, 16>}, {pipeline_mode = #tpu.pipeline_mode<synchronous>, transform_indices = @transform_4, window_bounds = array<i64: 1, 16>}, {transform_indices = @transform_5, window_bounds = array<i64: 16, 16>}, {pipeline_mode = #tpu.pipeline_mode<synchronous>, transform_indices = @transform_6, window_bounds = array<i64: 1, 16>}, {pipeline_mode = #tpu.pipeline_mode<synchronous>, transform_indices = @transform_7, window_bounds = array<i64: 1, 16>}]} {
    %c0_i32 = arith.constant 0 : i32
    %0 = arith.cmpi eq, %arg0, %c0_i32 : i32
    %1 = arith.extui %0 : i1 to i32
    %c0_i32_0 = arith.constant 0 : i32
    %2 = arith.cmpi ne, %1, %c0_i32_0 : i32
    scf.if %2 {
      %cst_19 = arith.constant 0.000000e+00 : f32
      %24 = vector.broadcast %cst_19 : f32 to vector<1x16xf32>
      %c0_20 = arith.constant 0 : index
      %c0_21 = arith.constant 0 : index
      %25 = vector.load %arg9[%c0_20, %c0_21] : memref<1x16xf32, #tpu.memory_space<vmem>>, vector<1x16xf32>
      tpu.vector_store %arg9[%c0_20, %c0_21], %24 {strides = array<i32>} : memref<1x16xf32, #tpu.memory_space<vmem>>, vector<1x16xf32>,
      %cst_22 = arith.constant 0.000000e+00 : f32
      %26 = vector.broadcast %cst_22 : f32 to vector<1x16xf32>
      %c0_23 = arith.constant 0 : index
      %c0_24 = arith.constant 0 : index
      %27 = vector.load %arg10[%c0_23, %c0_24] : memref<1x16xf32, #tpu.memory_space<vmem>>, vector<1x16xf32>
      tpu.vector_store %arg10[%c0_23, %c0_24], %26 {strides = array<i32>} : memref<1x16xf32, #tpu.memory_space<vmem>>, vector<1x16xf32>,
    } else {
    }
    %c0 = arith.constant 0 : index
    %c0_1 = arith.constant 0 : index
    %3 = vector.load %arg1[%c0, %c0_1] : memref<16x256xbf16, #tpu.memory_space<vmem>>, vector<16x256xbf16>
    %c0_2 = arith.constant 0 : index
    %c0_3 = arith.constant 0 : index
    %4 = vector.load %arg2[%c0_2, %c0_3] : memref<256x16xbf16, #tpu.memory_space<vmem>>, vector<256x16xbf16>
    %cst = arith.constant dense<0.000000e+00> : vector<16x16xf32>
    %5 = tpu.matmul %3, %4, %cst {dimension_numbers = #tpu.dot_dimension_numbers<[1], [0], [0], [1], [0, 0, 1, 1], [], []>} : vector<16x256xbf16>, vector<256x16xbf16>, vector<16x16xf32> -> vector<16x16xf32>
    %c0_4 = arith.constant 0 : index
    %c0_5 = arith.constant 0 : index
    %6 = vector.load %arg3[%c0_4, %c0_5] : memref<1x16xf32, #tpu.memory_space<vmem>>, vector<1x16xf32>
    %7 = vector.broadcast %6 : vector<1x16xf32> to vector<16x16xf32>
    %8 = arith.addf %5, %7 : vector<16x16xf32>
    %c0_6 = arith.constant 0 : index
    %c0_7 = arith.constant 0 : index
    %9 = vector.load %arg6[%c0_6, %c0_7] : memref<16x16xf32, #tpu.memory_space<vmem>>, vector<16x16xf32>
    tpu.vector_store %arg6[%c0_6, %c0_7], %8 {strides = array<i32>} : memref<16x16xf32, #tpu.memory_space<vmem>>, vector<16x16xf32>,
    %c0_8 = arith.constant 0 : index
    %c0_9 = arith.constant 0 : index
    %10 = vector.load %arg9[%c0_8, %c0_9] : memref<1x16xf32, #tpu.memory_space<vmem>>, vector<1x16xf32>
    %cst_10 = arith.constant dense<0.000000e+00> : vector<16xf32>
    %11 = vector.multi_reduction <add>, %8, %cst_10 [0] : vector<16x16xf32> to vector<16xf32>
    %12 = vector.shape_cast %11 : vector<16xf32> to vector<1x16xf32>
    %13 = arith.addf %10, %12 : vector<1x16xf32>
    %c0_11 = arith.constant 0 : index
    %c0_12 = arith.constant 0 : index
    %14 = vector.load %arg9[%c0_11, %c0_12] : memref<1x16xf32, #tpu.memory_space<vmem>>, vector<1x16xf32>
    tpu.vector_store %arg9[%c0_11, %c0_12], %13 {strides = array<i32>} : memref<1x16xf32, #tpu.memory_space<vmem>>, vector<1x16xf32>,
    %c0_13 = arith.constant 0 : index
    %c0_14 = arith.constant 0 : index
    %15 = vector.load %arg10[%c0_13, %c0_14] : memref<1x16xf32, #tpu.memory_space<vmem>>, vector<1x16xf32>
    %16 = arith.mulf %8, %8 : vector<16x16xf32>
    %cst_15 = arith.constant dense<0.000000e+00> : vector<16xf32>
    %17 = vector.multi_reduction <add>, %16, %cst_15 [0] : vector<16x16xf32> to vector<16xf32>
    %18 = vector.shape_cast %17 : vector<16xf32> to vector<1x16xf32>
    %19 = arith.addf %15, %18 : vector<1x16xf32>
    %c0_16 = arith.constant 0 : index
    %c0_17 = arith.constant 0 : index
    %20 = vector.load %arg10[%c0_16, %c0_17] : memref<1x16xf32, #tpu.memory_space<vmem>>, vector<1x16xf32>
    tpu.vector_store %arg10[%c0_16, %c0_17], %19 {strides = array<i32>} : memref<1x16xf32, #tpu.memory_space<vmem>>, vector<1x16xf32>,
    %c1_i32 = arith.constant 1 : i32
    %21 = arith.cmpi eq, %arg0, %c1_i32 : i32
    %22 = arith.extui %21 : i1 to i32
    %c0_i32_18 = arith.constant 0 : i32
    %23 = arith.cmpi ne, %22, %c0_i32_18 : i32
    scf.if %23 {
      %c0_19 = arith.constant 0 : index
      %c0_20 = arith.constant 0 : index
      %24 = vector.load %arg9[%c0_19, %c0_20] : memref<1x16xf32, #tpu.memory_space<vmem>>, vector<1x16xf32>
      %cst_21 = arith.constant 3.125000e-02 : f32
      %25 = vector.broadcast %cst_21 : f32 to vector<1x16xf32>
      %26 = arith.mulf %24, %25 : vector<1x16xf32>
      %c0_22 = arith.constant 0 : index
      %c0_23 = arith.constant 0 : index
      %27 = vector.load %arg10[%c0_22, %c0_23] : memref<1x16xf32, #tpu.memory_space<vmem>>, vector<1x16xf32>
      %cst_24 = arith.constant 3.125000e-02 : f32
      %28 = vector.broadcast %cst_24 : f32 to vector<1x16xf32>
      %29 = arith.mulf %27, %28 : vector<1x16xf32>
      %30 = arith.mulf %26, %26 : vector<1x16xf32>
      %31 = arith.subf %29, %30 : vector<1x16xf32>
      %c0_25 = arith.constant 0 : index
      %c0_26 = arith.constant 0 : index
      %32 = vector.load %arg4[%c0_25, %c0_26] : memref<1x16xf32, #tpu.memory_space<vmem>>, vector<1x16xf32>
      %cst_27 = arith.constant 9.99999974E-6 : f32
      %33 = vector.broadcast %cst_27 : f32 to vector<1x16xf32>
      %34 = arith.addf %31, %33 : vector<1x16xf32>
      %35 = math.rsqrt %34 : vector<1x16xf32>
      %36 = arith.mulf %32, %35 : vector<1x16xf32>
      %c0_28 = arith.constant 0 : index
      %c0_29 = arith.constant 0 : index
      %37 = vector.load %arg7[%c0_28, %c0_29] : memref<1x16xf32, #tpu.memory_space<vmem>>, vector<1x16xf32>
      tpu.vector_store %arg7[%c0_28, %c0_29], %36 {strides = array<i32>} : memref<1x16xf32, #tpu.memory_space<vmem>>, vector<1x16xf32>,
      %c0_30 = arith.constant 0 : index
      %c0_31 = arith.constant 0 : index
      %38 = vector.load %arg5[%c0_30, %c0_31] : memref<1x16xf32, #tpu.memory_space<vmem>>, vector<1x16xf32>
      %39 = arith.mulf %26, %36 : vector<1x16xf32>
      %40 = arith.subf %38, %39 : vector<1x16xf32>
      %c0_32 = arith.constant 0 : index
      %c0_33 = arith.constant 0 : index
      %41 = vector.load %arg8[%c0_32, %c0_33] : memref<1x16xf32, #tpu.memory_space<vmem>>, vector<1x16xf32>
      tpu.vector_store %arg8[%c0_32, %c0_33], %40 {strides = array<i32>} : memref<1x16xf32, #tpu.memory_space<vmem>>, vector<1x16xf32>,
    } else {
    }
    return
  }
  func.func @transform_0(%arg0: i32) -> (i32, i32) {
    %c0_i32 = arith.constant 0 : i32
    %c0_i32_0 = arith.constant 0 : i32
    return %arg0, %c0_i32 : i32, i32
  }
  func.func @transform_1(%arg0: i32) -> (i32, i32) {
    %c0_i32 = arith.constant 0 : i32
    %c0_i32_0 = arith.constant 0 : i32
    %c0_i32_1 = arith.constant 0 : i32
    return %c0_i32, %c0_i32_0 : i32, i32
  }
  func.func @transform_2(%arg0: i32) -> (i32, i32) {
    %c0_i32 = arith.constant 0 : i32
    %c0_i32_0 = arith.constant 0 : i32
    %c0_i32_1 = arith.constant 0 : i32
    return %c0_i32, %c0_i32_0 : i32, i32
  }
  func.func @transform_3(%arg0: i32) -> (i32, i32) {
    %c0_i32 = arith.constant 0 : i32
    %c0_i32_0 = arith.constant 0 : i32
    %c0_i32_1 = arith.constant 0 : i32
    return %c0_i32, %c0_i32_0 : i32, i32
  }
  func.func @transform_4(%arg0: i32) -> (i32, i32) {
    %c0_i32 = arith.constant 0 : i32
    %c0_i32_0 = arith.constant 0 : i32
    %c0_i32_1 = arith.constant 0 : i32
    return %c0_i32, %c0_i32_0 : i32, i32
  }
  func.func @transform_5(%arg0: i32) -> (i32, i32) {
    %c0_i32 = arith.constant 0 : i32
    %c0_i32_0 = arith.constant 0 : i32
    return %arg0, %c0_i32 : i32, i32
  }
  func.func @transform_6(%arg0: i32) -> (i32, i32) {
    %c0_i32 = arith.constant 0 : i32
    %c0_i32_0 = arith.constant 0 : i32
    %c0_i32_1 = arith.constant 0 : i32
    return %c0_i32, %c0_i32_0 : i32, i32
  }
  func.func @transform_7(%arg0: i32) -> (i32, i32) {
    %c0_i32 = arith.constant 0 : i32
    %c0_i32_0 = arith.constant 0 : i32
    %c0_i32_1 = arith.constant 0 : i32
    return %c0_i32, %c0_i32_0 : i32, i32
  }
}

</mosaic_0001>

<bundles_post_ra>
// kernel: tile.13
= control target key start
LH: loop header
LB: loop body
LE: loop exit
PB: predicated region body
PF: predicated region fallthrough
CT: control target
= control target key end

     0   :  { %s22_s0 = inlined_call_operand.vmem [shape: f32[8], index: 0, kind: input, shape index: {}]   ;;  %s23_s1 = inlined_call_operand.vmem [shape: f32[2,8], index: 1, kind: output, shape index: {}]  }
   0x1   :  { %v4_v0 = vld [vmem:[%s22_s0] ss:$0 sm:$0xff] }
   0x2   :  { %5 = vst [vmem:[%s23_s1] sm:$0x3] %v4_v0 }

// kernel: tile.14
= control target key start
LH: loop header
LB: loop body
LE: loop exit
PB: predicated region body
PF: predicated region fallthrough
CT: control target
= control target key end

     0   :  { %vm7_vm0 = vcmask 64512   ;;  %vm13_vm1 = vcmask 130112   ;;  %s39_s0 = inlined_call_operand.vmem [shape: f32[2,8], index: 0, kind: input, shape index: {}]   ;;  %s40_s1 = inlined_call_operand.vmem [shape: f32[1,16], index: 1, kind: output, shape index: {}]  }
   0x1   :  { %v4_v0 = vld [vmem:[%s39_s0] sm:$0x3]  ;;  %s22_s0 = smov 8  }
   0x2   :  { %5 = vst [vmem:[#allocation1] sm:$0x3] %v4_v0 }
   0x9   :  { %v10_v1 = vld [vmem:[#allocation1 + $0x1] sm:$0x1]   ;;  %v6_v2 = vld [vmem:[#allocation1] sm:$0x1]  }
   0xa   :  { %11 = vrot.lane.b32.xlu0 %v10_v1, %s22_s0  ;;  %8 = vst.msk [vmem:[#allocation0] sm:$0x1] %vm7_vm0, %v6_v2  }
  0x7c   :  { %v12_v3 = vpop.permute.xlu0 %11  }
  0x7d   :  { %14 = vst.msk [vmem:[#allocation0] sm:$0x1] %vm13_vm1, %v12_v3  }
  0x84   :  { %v17_v4 = vld [vmem:[#allocation0] sm:$0x1] }
  0x85   :  { %20 = vst [vmem:[%s40_s1] sm:$0x1] %v17_v4 }

// kernel: fea_split_forward.3
= control target key start
LH: loop header
LB: loop body
LE: loop exit
PB: predicated region body
PF: predicated region fallthrough
CT: control target
= control target key end

     0   :  { %s296_s12 = smov 0   ;;  %s313_s0 = inlined_call_operand.vmem [shape: f32[32,16], index: 0, kind: input, shape index: {}]   ;;  %s314_s1 = inlined_call_operand.vmem [shape: f32[1,16], index: 1, kind: input, shape index: {}]   ;;  %s315_s2 = inlined_call_operand.vmem [shape: f32[1,16], index: 2, kind: input, shape index: {}]   ;;  %s316_s3 = inlined_call_operand.vmem [shape: f32[32,16], index: 3, kind: output, shape index: {}]  }
   0x1 LB: > { %s247_s13 = sadd.s32 4294967295, %s274_s12   ;;  %p251_p0 = scmp.ge.s32.totalorder %s274_s12, 1  ;;  %s274_s12 = sphi %s296_s12, %s13_s12  }
   0x2   : > { %p138_p1 = scmp.lt.s32.totalorder %s274_s12, 3 }
   0x4   : > { %p139_p2 = pnand %p251_p0, %p138_p1 }
   0x5   : > { %s252_s14 = sshll.u32 (!%p139_p2), %s247_s13, 1 }
   0x6   : > { %142 = sbr.rel (%p139_p2) target bundleno = 21 (0x15), region = 32  ;;  %p163_p3 = scmp.lt.s32.totalorder (!%p139_p2), %s252_s14, 3 }
   0xb   : > { %s318_s14 = smov (!%p163_p3, %s252_s14), 3  ;;  %v266_v0 = vld [vmem:[%s314_s1] ss:$0 sm:$0xff]  ;;  %vm188_vm0 = vcmask 130048  }
   0xc   : > { %s253_s17 = sshll.u32 %s318_s14, 3  ;;  %v267_v1 = vld [vmem:[%s315_s2] ss:$0 sm:$0xff] }
   0xd   : > { %s166_s20 = scalar_lea.vmem %s313_s0, %s253_s17  ;;  %s172_s25 = scalar_lea.vmem %s316_s3, %s253_s17 }
   0xe   : > { %v174_v2 = vld [vmem:[%s166_s20] sm:$0xff]  ;;  %v175_v3 = vld [vmem:[%s166_s20 + $0x8] sm:$0xff] }
   0xf   : > { %v180_v4 = vmul.f32 %v266_v0, %v174_v2  ;;  %v181_v5 = vmul.f32 %v266_v0, %v175_v3 }
  0x11   : > { %v186_v6 = vadd.f32 %v267_v1, %v180_v4  ;;  %v187_v7 = vadd.f32 %v267_v1, %v181_v5 }
  0x13   : > { %189 = vst.msk [vmem:[%s172_s25] sm:$0xff] %vm188_vm0, %v186_v6 }
  0x14   : > { %190 = vst.msk [vmem:[%s172_s25 + $0x8] sm:$0xff] %vm188_vm0, %v187_v7 }
  0x15 PF: > { %s13_s12 = sadd.s32 1, %s274_s12  }
  0x16   : > { %p10_p4 = scmp.ge.s32.totalorder %s13_s12, 4  }
  0x18   :  { %12 = sbr.rel (!%p10_p4) target bundleno = 1 (0x1), region = 62 }

// kernel: fea_split_forward.2
= control target key start
LH: loop header
LB: loop body
LE: loop exit
PB: predicated region body
PF: predicated region fallthrough
CT: control target
= control target key end

     0   :  { %s751_s24 = smov 0   ;;  %s850_s0 = inlined_call_operand.vmem [shape: bf16[32,256], index: 0, kind: input, shape index: {}]   ;;  %s851_s1 = inlined_call_operand.vmem [shape: bf16[256,16], index: 1, kind: input, shape index: {}]   ;;  %s852_s2 = inlined_call_operand.vmem [shape: f32[1,16], index: 2, kind: input, shape index: {}]   ;;  %s853_s3 = inlined_call_operand.vmem [shape: f32[1,16], index: 3, kind: input, shape index: {}]   ;;  %s854_s4 = inlined_call_operand.vmem [shape: f32[1,16], index: 4, kind: input, shape index: {}]   ;;  %s855_s5 = inlined_call_operand.vmem [shape: f32[32,16], index: 5, kind: output, shape index: {0}]   ;;  %s856_s6 = inlined_call_operand.vmem [shape: f32[1,16], index: 6, kind: output, shape index: {1}]   ;;  %s857_s7 = inlined_call_operand.vmem [shape: f32[1,16], index: 7, kind: output, shape index: {2}]  }
   0x1 LB: > { %s757_s25 = sadd.s32 4294967295, %s708_s24   ;;  %p589_p0 = scmp.ge.s32.totalorder %s708_s24, 1  ;;  %s708_s24 = sphi %s751_s24, %s18_s24  }
   0x2   : > { %p234_p1 = scmp.lt.s32.totalorder %s708_s24, 3 }
   0x4   : > { %p235_p2 = pnand %p589_p0, %p234_p1 }
   0x5   : > { %s590_s26 = sshll.u32 (!%p235_p2), %s757_s25, 1  ;;  %p595_p4 = scmp.ne.s32.totalorder (!%p235_p2), %s757_s25, 0 }
   0x6   : > { %238 = sbr.rel (%p235_p2) target bundleno = 247 (0xf7), region = 40  ;;  %p268_p3 = scmp.lt.s32.totalorder (!%p235_p2), %s590_s26, 3 }
   0xb   : > { %s859_s26 = smov (!%p268_p3, %s590_s26), 3  ;;  %283 = sbr.rel (%p595_p4) target bundleno = 19 (0x13), region = 44 }
   0xc   : > { %s671_s27 = sshll.u32 %s859_s26, 3 }
   0xd   : > { %s765_s30 = scalar_lea.vmem %s850_s0, %s671_s27  ;;  %s770_s10 = scalar_lea.vmem %s855_s5, %s671_s27 }
  0x10   : > { %vm284_vm0 = vcmask 122880   ;;  %v710_v0 = vmov 0.0  }
  0x11   : > { %285 = vst.msk [vmem:[#allocation2] sm:$0x1] %vm284_vm0, %v710_v0 }
  0x12   : > { %286 = vst.msk [vmem:[#allocation3] sm:$0x1] %vm284_vm0, %v710_v0 }
  0x13 PF: > { %v681_v1 = vld [vmem:[%s851_s1 + $0x38] sm:$0xff]  ;;  %v680_v3 = vld [vmem:[%s851_s1 + $0x30] sm:$0xff]  ;;  %v679_v5 = vld [vmem:[%s851_s1 + $0x28] sm:$0xff]  ;;  %vm459_vm1 = vcmask 130048   ;;  %vm473_vm2 = vcmask 122880   ;;  %p668_p5 = scmp.ne.s32.totalorder %s757_s25, 1 }
  0x14   : > { %v689_v2 = vld [vmem:[%s851_s1 + $0x78] sm:$0xff]  ;;  %431 = vmatpush.bf16.msra.mxu0 %v681_v1  ;;  %v688_v4 = vld [vmem:[%s851_s1 + $0x70] sm:$0xff]  ;;  %v687_v6 = vld [vmem:[%s851_s1 + $0x68] sm:$0xff] }
  0x15   : > { %445 = vmatpush.bf16.msra.mxu1 %v689_v2  ;;  %v678_v7 = vld [vmem:[%s851_s1 + $0x20] sm:$0xff]  ;;  %v677_v9 = vld [vmem:[%s851_s1 + $0x18] sm:$0xff]  ;;  %v676_v11 = vld [vmem:[%s851_s1 + $0x10] sm:$0xff] }
  0x16   : > { %v686_v8 = vld [vmem:[%s851_s1 + $0x60] sm:$0xff]  ;;  %v685_v10 = vld [vmem:[%s851_s1 + $0x58] sm:$0xff]  ;;  %v684_v12 = vld [vmem:[%s851_s1 + $0x50] sm:$0xff] }
  0x17   : > { %v675_v13 = vld [vmem:[%s851_s1 + $0x8] sm:$0xff]  ;;  %v674_v15 = vld [vmem:[%s851_s1] sm:$0xff] }
  0x18   : > { %432 = vmatpush.bf16.msra.mxu0 %v680_v3  ;;  %v683_v14 = vld [vmem:[%s851_s1 + $0x48] sm:$0xff]  ;;  %v682_v16 = vld [vmem:[%s851_s1 + $0x40] sm:$0xff] }
  0x19   : > { %446 = vmatpush.bf16.msra.mxu1 %v688_v4  ;;  %v598_v17 = vld [vmem:[%s765_s30] sm:$0xf]  ;;  %v673_v18 = vld [vmem:[%s765_s30 + $0x4] sm:$0xf0]  ;;  %v672_v19 = vld [vmem:[%s765_s30 + $0x4] sm:$0xf] }
  0x1a   : > { %v600_v20 = vld [vmem:[%s765_s30 + $0x8] sm:$0xf0]  ;;  %v599_v21 = vor.u32 %v673_v18, %v598_v17  ;;  %v699_v23 = vld [vmem:[%s852_s2] ss:$0 sm:$0xff]  ;;  %v475_v52 = vld [vmem:[#allocation3] sm:$0x1] }
  0x1b   : > { %v603_v22 = vor.u32 %v672_v19, %v600_v20  ;;  %v462_v49 = vld [vmem:[#allocation2] sm:$0x1] }
  0x1c   : > { %433 = vmatpush.bf16.msra.mxu0 %v679_v5 }
  0x1d   : > { %447 = vmatpush.bf16.msra.mxu1 %v687_v6 }
  0x20   : > { %434 = vmatpush.bf16.msra.mxu0 %v678_v7 }
  0x21   : > { %448 = vmatpush.bf16.msra.mxu1 %v686_v8 }
  0x24   : > { %435 = vmatpush.bf16.msra.mxu0 %v677_v9 }
  0x25   : > { %449 = vmatpush.bf16.msra.mxu1 %v685_v10 }
  0x28   : > { %436 = vmatpush.bf16.msra.mxu0 %v676_v11 }
  0x29   : > { %450 = vmatpush.bf16.msra.mxu1 %v684_v12 }
  0x2c   : > { %437 = vmatpush.bf16.msra.mxu0 %v675_v13 }
  0x2d   : > { %451 = vmatpush.bf16.msra.mxu1 %v683_v14 }
  0x30   : > { %438 = vmatpush.bf16.msra.mxu0 %v674_v15 }
  0x31   : > { %452 = vmatpush.bf16.msra.mxu1 %v682_v16 }
  0x33   : > { %439 = vmatmul.bf16.vlgmr.msra.gmra.mxu0 %v599_v21 }
  0x34   : > { %453 = vmatmul.bf16.vlgmr.msra.gmra.mxu1 %v603_v22 }
  0xb0   : > { %v440_v24 = vpop.f32.mrf.mxu0 }
  0xb1   : > { %v454_v25 = vpop.f32.mrf.mxu1  ;;  %v441_v26 = vadd.f32 %v699_v23, %v440_v24 }
  0xb3   : > { %v455_v27 = vadd.f32 %v454_v25, %v441_v26 }
  0xb5   : > { %460 = vst.msk [vmem:[%s770_s10] sm:$0xff] %vm459_vm1, %v455_v27  ;;  %v476_v31 = vmul.f32 %v455_v27, %v455_v27  ;;  %v463_v33 = vsel %vm459_vm1, %v455_v27, 0.0 }
  0xb7   : > { %v478_v37 = vsel %vm459_vm1, %v476_v31, 0.0 }
  0xb8   : > { %v442_v28 = vpop.f32.mrf.mxu0 }
  0xb9   : > { %v443_v29 = vadd.f32 %v699_v23, %v442_v28  ;;  %v456_v30 = vpop.f32.mrf.mxu1 }
  0xbb   : > { %v457_v32 = vadd.f32 %v456_v30, %v443_v29 }
  0xbd   : > { %461 = vst.msk [vmem:[%s770_s10 + $0x8] sm:$0xff] %vm459_vm1, %v457_v32  ;;  %v464_v34 = vsel %vm459_vm1, %v457_v32, 0.0  ;;  %v477_v35 = vmul.f32 %v457_v32, %v457_v32 }
  0xbe   : > { %v465_v36 = vadd.f32 %v464_v34, %v463_v33 }
  0xbf   : > { %v479_v38 = vsel %vm459_vm1, %v477_v35, 0.0 }
  0xc0   : > { %v466_v39 = vrot.slane %v465_v36, 4  ;;  %v480_v40 = vadd.f32 %v479_v38, %v478_v37 }
  0xc2   : > { %v467_v41 = vadd.f32 %v466_v39, %v465_v36  ;;  %v481_v42 = vrot.slane %v480_v40, 4 }
  0xc4   : > { %v468_v43 = vrot.slane %v467_v41, 2  ;;  %v482_v44 = vadd.f32 %v481_v42, %v480_v40 }
  0xc6   : > { %v469_v45 = vadd.f32 %v468_v43, %v467_v41  ;;  %v483_v46 = vrot.slane %v482_v44, 2 }
  0xc8   : > { %v470_v47 = vrot.slane %v469_v45, 1  ;;  %v484_v48 = vadd.f32 %v483_v46, %v482_v44 }
  0xca   : > { %v471_v50 = vadd.f32 %v470_v47, %v469_v45  ;;  %v485_v51 = vrot.slane %v484_v48, 1 }
  0xcc   : > { %v472_v53 = vadd.f32 %v471_v50, %v462_v49  ;;  %v486_v54 = vadd.f32 %v485_v51, %v484_v48  ;;  %492 = sbr.rel (%p668_p5) target bundleno = 247 (0xf7), region = 48 }
  0xce   : > { %474 = vst.msk [vmem:[#allocation2] sm:$0x1] %vm473_vm2, %v472_v53  ;;  %v487_v55 = vadd.f32 %v486_v54, %v475_v52 }
  0xd0   : > { %488 = vst.msk [vmem:[#allocation3] sm:$0x1] %vm473_vm2, %v487_v55 }
  0xd1   : > { %v499_v4 = vld [vmem:[%s853_s3] sm:$0x1] }
  0xd2   : > { %v513_v8 = vld [vmem:[%s854_s4] sm:$0x1] }
  0xd5   : > { %v493_v56 = vld [vmem:[#allocation2] sm:$0x1] }
  0xd6   : > { %v494_v58 = vmul.f32 0.03125, %v493_v56 }
  0xd7   : > { %v495_v57 = vld [vmem:[#allocation3] sm:$0x1] }
  0xd8   : > { %v496_v59 = vmul.f32 0.03125, %v495_v57  ;;  %v497_v60 = vmul.f32 %v494_v58, %v494_v58 }
  0xda   : > { %v498_v61 = vsub.f32 %v496_v59, %v497_v60 }
  0xdc   : > { %v500_v62 = vadd.f32 1e-05, %v498_v61 }
  0xde   : > { %700 = vrsqrt.f32 %v500_v62  ;;  %vm507_vm3 = vweird.f32 %v500_v62 }
  0xe4   : > { %v701_v63 = vpop.eup %700 }
  0xe5   : > { %v502_v0 = vmul.f32 %v701_v63, %v500_v62  ;;  %vm508_vm4 = vweird.f32 %v701_v63 }
  0xe6   : > { %vm509_vm5 = vmor %vm507_vm3, %vm508_vm4 }
  0xe7   : > { %v503_v1 = vmul.f32 %v701_v63, %v502_v0 }
  0xe9   : > { %v504_v2 = vmul.f32 0.5, %v503_v1 }
  0xeb   : > { %v505_v3 = vsub.f32 1.5, %v504_v2 }
  0xed   : > { %v506_v5 = vmul.f32 %v701_v63, %v505_v3 }
  0xef   : > { %v510_v6 = vsel %vm509_vm5, %v701_v63, %v506_v5 }
  0xf0   : > { %v511_v7 = vmul.f32 %v510_v6, %v499_v4 }
  0xf2   : > { %512 = vst.msk [vmem:[%s856_s6] sm:$0x1] %vm473_vm2, %v511_v7  ;;  %v514_v9 = vmul.f32 %v511_v7, %v494_v58 }
  0xf4   : > { %v515_v10 = vsub.f32 %v513_v8, %v514_v9 }
  0xf6   : > { %516 = vst.msk [vmem:[%s857_s7] sm:$0x1] %vm473_vm2, %v515_v10 }
  0xf7 PF: > { %s18_s24 = sadd.s32 1, %s708_s24  }
  0xf8   : > { %p15_p6 = scmp.ge.s32.totalorder %s18_s24, 4  }
  0xfa   :  { %17 = sbr.rel (!%p15_p6) target bundleno = 1 (0x1), region = 94 }

</bundles_post_ra>
